<compile_context>
chip_gen: v7x
topology: tpu7x:2x2x1
jax: 0.10.0
libtpu: 0.0.40
codegen_flags: <defaults>
</compile_context>

<pallas_src>
import jax
import jax.numpy as jnp
import numpy as np
from jax.experimental import pallas as pl
from jax.experimental.pallas import tpu as pltpu


def _round_up(v, m):
    return ((v + m - 1) // m) * m


def _cdiv(a, b):
    return -(-a // b)


def _fits_kernel(x_ref, kmat_ref, bias_ref, out_ref):
    # x_ref   : (tb, KSp)    bf16  flattened (channel, time) per batch row
    # kmat_ref: (KSp, Pout)  bf16  folded rfft->cLinear->pad->irfft->*ratio->Conv1d map
    # bias_ref: (1, Pout)    f32   conv bias + conv(complex-linear bias) per output time
    # out_ref : (tb, Pout)   f32
    out_ref[...] = (
        jnp.dot(x_ref[...], kmat_ref[...], preferred_element_type=jnp.float32)
        + bias_ref[...]
    )


def _pick_batch_tile(batch, ksp, pout, *, budget_bytes=10 << 20, max_tile=2048):
    """Batch tile (multiple of 16), grid steps, padded batch.

    Sized so 2x double-buffered x tiles + out tiles + resident constants stay under a budget that
    fits every generation's default scoped VMEM; keeps an even >=2-step grid when batch allows so
    v7x's two TensorCores both get work.
    """
    per_row = 2 * ksp * 2 + 2 * pout * 4                     # bf16 x row (x2 bufs) + f32 out row (x2)
    const_bytes = 2 * ksp * pout * 2 + 2 * 8 * pout * 4      # Kmat (x2 bufs) + bias tile
    avail = max(budget_bytes - const_bytes, per_row * 16)
    tb_cap = max(16, min(max_tile, (avail // per_row) // 16 * 16))

    b_eff = _round_up(max(batch, 16), 16)
    steps = _cdiv(b_eff, tb_cap)
    if b_eff >= 32:
        steps = max(steps, 2)                                # let v7x shard across both TCs
    if steps > 1 and steps % 2 == 1:
        steps += 1                                           # balanced megacore split
    tb = min(tb_cap, _round_up(_cdiv(b_eff, steps), 16))
    grid = _cdiv(b_eff, tb)
    if grid > 1 and grid % 2 == 1:
        grid += 1
    return tb, grid, grid * tb


def _fold_constants(seq_len, pred_len, dominance_freq, up_w, up_b, conv_w, conv_b):
    """Fold the whole spectral chain AND the Conv1d host-side (float64) into Kmat / bias."""
    S, P, dom = int(seq_len), int(pred_len), int(dominance_freq)
    n_full = S + P
    K_full = n_full // 2 + 1                 # int((seq_len+pred_len)/2 + 1)
    n_out = 2 * (K_full - 1)                 # torch.fft.irfft default output length
    length_ratio = n_full / S
    dom_up = int(dom * length_ratio)

    W = np.asarray(up_w).astype(np.complex128)            # (dom_up, dom)
    b = np.asarray(up_b).astype(np.complex128)            # (dom_up,)
    cwf = np.asarray(conv_w, dtype=np.float64)            # (1, k, 3)
    k = int(cwf.shape[1])
    cw = cwf.reshape(k, 3)
    cb = float(np.asarray(conv_b).reshape(-1)[0])

    assert W.shape == (dom_up, dom), (W.shape, (dom_up, dom))
    assert dom <= S // 2 + 1, "dominance_freq exceeds rfft length of the input"
    assert dom_up <= K_full
    assert n_out - P - 1 >= 0

    # 1) rfft (norm='backward'), first `dom` bins, as real matrices (S, dom)
    t = np.arange(S, dtype=np.float64)[:, None]
    f = np.arange(dom, dtype=np.float64)[None, :]
    ang = 2.0 * np.pi * t * f / S
    Fr = np.cos(ang)
    Fi = -np.sin(ang)

    # 2) complex Linear: Y = X @ W.T + b
    Wt = W.T
    Wr, Wi = Wt.real, Wt.imag
    br, bi = b.real, b.imag

    # 3) irfft (norm='backward', n=n_out) restricted to the absolute-time window
    #    [n_out - P - 1, n_out - 1] plus one trailing zero column (the conv's right zero pad).
    #    NOTE: assumes standard c2r semantics (Im(DC) / Im(Nyquist) ignored), as torch.fft.irfft.
    m_abs = (n_out - P - 1) + np.arange(P + 1, dtype=np.float64)[None, :]   # (1, P+1)
    fr = np.arange(dom_up, dtype=np.float64)[:, None]                       # (dom_up, 1)
    w_herm = np.where((fr == 0) | (fr == K_full - 1), 1.0, 2.0)
    ang2 = 2.0 * np.pi * fr * m_abs / n_out
    Gr = w_herm * np.cos(ang2) / n_out                    # (dom_up, P+1)
    Gi = -w_herm * np.sin(ang2) / n_out

    A_r = Wr @ Gr + Wi @ Gi                               # applied to Re(X)
    A_i = -Wi @ Gr + Wr @ Gi                              # applied to Im(X)
    M_win = (Fr @ A_r + Fi @ A_i) * length_ratio          # (S, P+1)
    c_win = (br @ Gr + bi @ Gi) * length_ratio            # (P+1,)
    M_win = np.concatenate([M_win, np.zeros((S, 1))], axis=1)    # (S, P+2)
    c_win = np.concatenate([c_win, np.zeros((1,))], axis=0)      # (P+2,)

    # 4) fold Conv1d(k->1, kernel=3, padding=1): output column j (absolute time n_out - P + j)
    #    reads window columns j, j+1, j+2.
    Kmat = np.zeros((k, S, P), np.float64)
    for d in range(3):
        Kmat += cw[:, d][:, None, None] * M_win[None, :, d:d + P]
    Kmat = Kmat.reshape(k * S, P)
    wsum = cw.sum(axis=0)
    out_bias = cb + wsum[0] * c_win[0:P] + wsum[1] * c_win[1:P + 1] + wsum[2] * c_win[2:P + 2]

    # 5) pad: contraction dim -> multiple of 128 (lane-dense x loads), output dim -> multiple of 128
    KS = k * S
    KSp = _round_up(KS, 128)
    Pout = _round_up(P, 128)
    Kmat_pad = np.zeros((KSp, Pout), np.float32)
    Kmat_pad[:KS, :P] = Kmat
    bias_pad = np.zeros((1, Pout), np.float32)
    bias_pad[0, :P] = out_bias

    return jnp.asarray(Kmat_pad, jnp.bfloat16), jnp.asarray(bias_pad, jnp.float32), KSp, Pout


def fits_forward(x, up_w, up_b, conv_w, conv_b, *, seq_len, pred_len, dominance_freq=30):
    """x: (B, k, seq_len) real. Returns (B, 1, pred_len), matching FITS.forward."""
    x = jnp.asarray(x)
    B, k, S_in = x.shape
    assert S_in == seq_len
    assert tuple(np.shape(conv_w)) == (1, k, 3)

    # Concrete NumPy weights required here (bakes weights into constants; cache outside any jit).
    Kmat, bias, KSp, Pout = _fold_constants(
        seq_len, pred_len, dominance_freq, up_w, up_b, conv_w, conv_b)

    KS = k * seq_len
    tb, grid, B_pad = _pick_batch_tile(B, KSp, Pout)

    # (B, k, S) -> (B, k*S) rows match Kmat row index c*S + s; bf16 operands, zero-pad B and KS.
    x2d = x.astype(jnp.bfloat16).reshape(B, KS)
    x2d = jnp.pad(x2d, ((0, B_pad - B), (0, KSp - KS)))

    # Explicit scoped-VMEM budget (estimate + margin), clamped so it is valid on v5e/v6e/v7x.
    vmem_est = (2 * tb * KSp * 2) + (2 * tb * Pout * 4) + (2 * KSp * Pout * 2) + (2 * 8 * Pout * 4)
    vmem_bytes = min(max(int(1.3 * vmem_est), 16 << 20), 48 << 20)

    out_pad = pl.pallas_call(
        _fits_kernel,
        out_shape=jax.ShapeDtypeStruct((B_pad, Pout), jnp.float32),
        grid=(grid,),
        in_specs=[
            pl.BlockSpec((tb, KSp), lambda i: (i, 0)),       # batch tile of flattened rows (bf16)
            pl.BlockSpec((KSp, Pout), lambda i: (0, 0)),     # folded map (constant index_map)
            pl.BlockSpec((1, Pout), lambda i: (0, 0)),       # folded per-time bias
        ],
        out_specs=pl.BlockSpec((tb, Pout), lambda i: (i, 0)),
        compiler_params=pltpu.CompilerParams(
            dimension_semantics=("parallel",),
            vmem_limit_bytes=vmem_bytes),
    )(x2d, Kmat, bias)

    return out_pad[:B, None, :pred_len]


def _reference_forward(x, up_w, up_b, conv_w, conv_b, *, seq_len, pred_len, dominance_freq=30):
    """Pure-JAX reference mirroring the PyTorch forward (uses jnp.fft, f32/c64)."""
    S, P, dom = seq_len, pred_len, dominance_freq
    n_full = S + P
    K_full = n_full // 2 + 1
    length_ratio = n_full / S
    B, k, _ = x.shape

    spec = jnp.fft.rfft(x.astype(jnp.float32), axis=-1)                       # (B,k,S//2+1)
    spec = spec[:, :, :dom]
    up = jnp.einsum('bcf,gf->bcg', spec, up_w.astype(jnp.complex64)) + up_b.astype(jnp.complex64)
    full = jnp.zeros((B, k, K_full), jnp.complex64)
    full = full.at[:, :, :up.shape[-1]].set(up)
    low_xy = jnp.fft.irfft(full, axis=-1) * length_ratio                      # (B,k,n_out)
    n_out = low_xy.shape[-1]

    # Conv1d(k -> 1, kernel=3, padding=1)
    xp = jnp.pad(low_xy, ((0, 0), (0, 0), (1, 1)))
    w = jnp.asarray(conv_w, jnp.float32).reshape(k, 3)
    out = (jnp.einsum('bct,c->bt', xp[:, :, 0:n_out], w[:, 0])
           + jnp.einsum('bct,c->bt', xp[:, :, 1:n_out + 1], w[:, 1])
           + jnp.einsum('bct,c->bt', xp[:, :, 2:n_out + 2], w[:, 2])) + conv_b[0]
    return out[:, None, -P:]


if __name__ == "__main__":
    # Small config consistent with the module: dominance_freq=30 requires seq_len//2+1 >= 30.
    B, k = 2, 4                         # configs.enc_in == configs.k == 4 channels
    seq_len, pred_len = 64, 16
    dominance_freq = 30
    length_ratio = (seq_len + pred_len) / seq_len
    dom_up = int(dominance_freq * length_ratio)     # 37

    key = jax.random.PRNGKey(0)
    kx, kwr, kwi, kbr, kbi, kcw, kcb = jax.random.split(key, 7)

    x = jax.random.normal(kx, (B, k, seq_len), jnp.float32)
    up_w = (0.1 * jax.random.normal(kwr, (dom_up, dominance_freq), jnp.float32)
            + 1j * 0.1 * jax.random.normal(kwi, (dom_up, dominance_freq), jnp.float32))
    up_b = (0.1 * jax.random.normal(kbr, (dom_up,), jnp.float32)
            + 1j * 0.1 * jax.random.normal(kbi, (dom_up,), jnp.float32))
    conv_w = 0.3 * jax.random.normal(kcw, (1, k, 3), jnp.float32)
    conv_b = 0.1 * jax.random.normal(kcb, (1,), jnp.float32)

    out = fits_forward(x, up_w, up_b, conv_w, conv_b,
                       seq_len=seq_len, pred_len=pred_len, dominance_freq=dominance_freq)
    out = jax.block_until_ready(out)
    assert out.shape == (B, 1, pred_len)

    ref = _reference_forward(x, up_w, up_b, conv_w, conv_b,
                             seq_len=seq_len, pred_len=pred_len, dominance_freq=dominance_freq)
    # bf16 MXU operands (f32 accumulation) vs a float32 FFT reference -> relaxed tolerances.
    np.testing.assert_allclose(np.asarray(out), np.asarray(ref), rtol=2e-2, atol=5e-3)

    print("KERNEL_OK")
</pallas_src>

<mosaic_0001>
module attributes {stable_mosaic.version = 11 : i64} {
  func.func @_fits_kernel(%arg0: i32, %arg1: memref<16x256xbf16, #tpu.memory_space<vmem>>, %arg2: memref<256x128xbf16, #tpu.memory_space<vmem>>, %arg3: memref<1x128xf32, #tpu.memory_space<vmem>>, %arg4: memref<16x128xf32, #tpu.memory_space<vmem>>) attributes {dimension_semantics = [#tpu.dimension_semantics<parallel>], iteration_bounds = array<i64: 1>, scalar_prefetch = 0 : i64, scratch_operands = 0 : i64, tpu.core_type = #tpu.core_type<tc>, window_params = [{transform_indices = @transform_0, window_bounds = array<i64: 16, 256>}, {pipeline_mode = #tpu.pipeline_mode<synchronous>, transform_indices = @transform_1, window_bounds = array<i64: 256, 128>}, {pipeline_mode = #tpu.pipeline_mode<synchronous>, transform_indices = @transform_2, window_bounds = array<i64: 1, 128>}, {transform_indices = @transform_3, window_bounds = array<i64: 16, 128>}]} {
    %c0 = arith.constant 0 : index
    %c0_0 = arith.constant 0 : index
    %0 = vector.load %arg1[%c0, %c0_0] : memref<16x256xbf16, #tpu.memory_space<vmem>>, vector<16x256xbf16>
    %c0_1 = arith.constant 0 : index
    %c0_2 = arith.constant 0 : index
    %1 = vector.load %arg2[%c0_1, %c0_2] : memref<256x128xbf16, #tpu.memory_space<vmem>>, vector<256x128xbf16>
    %cst = arith.constant dense<0.000000e+00> : vector<16x128xf32>
    %2 = tpu.matmul %0, %1, %cst {dimension_numbers = #tpu.dot_dimension_numbers<[1], [0], [0], [1], [0, 0, 1, 1], [], []>} : vector<16x256xbf16>, vector<256x128xbf16>, vector<16x128xf32> -> vector<16x128xf32>
    %c0_3 = arith.constant 0 : index
    %c0_4 = arith.constant 0 : index
    %3 = vector.load %arg3[%c0_3, %c0_4] : memref<1x128xf32, #tpu.memory_space<vmem>>, vector<1x128xf32>
    %4 = vector.broadcast %3 : vector<1x128xf32> to vector<16x128xf32>
    %5 = arith.addf %2, %4 : vector<16x128xf32>
    %c0_5 = arith.constant 0 : index
    %c0_6 = arith.constant 0 : index
    %6 = vector.load %arg4[%c0_5, %c0_6] : memref<16x128xf32, #tpu.memory_space<vmem>>, vector<16x128xf32>
    tpu.vector_store %arg4[%c0_5, %c0_6], %5 {strides = array<i32>} : memref<16x128xf32, #tpu.memory_space<vmem>>, vector<16x128xf32>,
    return
  }
  func.func @transform_0(%arg0: i32) -> (i32, i32) {
    %c0_i32 = arith.constant 0 : i32
    %c0_i32_0 = arith.constant 0 : i32
    return %arg0, %c0_i32 : i32, i32
  }
  func.func @transform_1(%arg0: i32) -> (i32, i32) {
    %c0_i32 = arith.constant 0 : i32
    %c0_i32_0 = arith.constant 0 : i32
    %c0_i32_1 = arith.constant 0 : i32
    return %c0_i32, %c0_i32_0 : i32, i32
  }
  func.func @transform_2(%arg0: i32) -> (i32, i32) {
    %c0_i32 = arith.constant 0 : i32
    %c0_i32_0 = arith.constant 0 : i32
    %c0_i32_1 = arith.constant 0 : i32
    return %c0_i32, %c0_i32_0 : i32, i32
  }
  func.func @transform_3(%arg0: i32) -> (i32, i32) {
    %c0_i32 = arith.constant 0 : i32
    %c0_i32_0 = arith.constant 0 : i32
    return %arg0, %c0_i32 : i32, i32
  }
}

</mosaic_0001>

<bundles_post_ra>
// kernel: tpu_custom_call.1
= control target key start
LH: loop header
LB: loop body
LE: loop exit
PB: predicated region body
PF: predicated region fallthrough
CT: control target
= control target key end

     0   :  { %8 = vsyncpa [#allocation3], 0  ;;  %s463_s0 = inlined_call_operand.hbm [shape: bf16[16,256], index: 0, kind: input, shape index: {}]   ;;  %s464_s1 = inlined_call_operand.hbm [shape: bf16[256,128], index: 1, kind: input, shape index: {}]   ;;  %s465_s2 = inlined_call_operand.vmem [shape: f32[1,128], index: 2, kind: input, shape index: {}]   ;;  %s466_s3 = inlined_call_operand.hbm [shape: f32[16,128], index: 3, kind: output, shape index: {}]  }
   0x1   :  { %9 = vsyncpa [#allocation6], 0 }
   0x2   :  { %10 = vsyncpa [#allocation4], 0  ;;  %s391_s12 = smov [#allocation2]   ;;  %s319_s16 = scalar_lea.hbm %s463_s0, 256 }
   0x3   :  { %s16_s13 = sshll.u32 %s391_s12, 4  ;;  %p320_p0 = scmp.ne.s32.totalorder %s463_s0, %s319_s16  ;;  %s17_s13 = int_to_ptr.vmem [resolvable:$true] %s16_s13 }
   0x4   :  { %p323_p1 = scmp.lt.u32.totalorder %s319_s16, %s463_s0 }
   0x6   :  { %p325_p2 = pnand %p323_p1, %p320_p0 }
   0x8   :  { %328 = shalt.err (!%p325_p2)
}
   0x9   :  { %s329_s21 = scalar_lea.vmem %s17_s13, 256  ;;  %p334_p4 = scmp.lt.s32.totalorder %s17_s13, %s17_s13 }
   0xa   :  { %p330_p3 = scmp.ne.s32.totalorder %s17_s13, %s329_s21  ;;  %p335_p5 = scmp.lt.s32.totalorder %s329_s21, %s329_s21 }
   0xc   :  { %p336_p6 = por %p335_p5, %p334_p4 }
   0xe   :  { %p337_p7 = pnand %p336_p6, %p330_p3 }
  0x10   :  { %340 = shalt.err (!%p337_p7)
}
  0x11   :  { %s392_s22 = smov 128   ;;  %s393_s23 = smov 8  }
  0x12   :  { %22 = dma.hbm_to_vmem [thread:$0]  %s463_s0, 256, %s17_s13, [#allocation3], %s392_s22, %s392_s22, %s393_s23  }
  0x13   :  { %s394_s26 = smov [#allocation5]   ;;  %s341_s30 = scalar_lea.hbm %s464_s1, 2048 }
  0x14   :  { %s28_s27 = sshll.u32 %s394_s26, 4  ;;  %p342_p8 = scmp.ne.s32.totalorder %s464_s1, %s341_s30  ;;  %s29_s27 = int_to_ptr.vmem [resolvable:$true] %s28_s27 }
  0x15   :  { %p345_p9 = scmp.lt.u32.totalorder %s341_s30, %s464_s1 }
  0x17   :  { %p347_p10 = pnand %p345_p9, %p342_p8 }
  0x19   :  { %350 = shalt.err (!%p347_p10)
}
  0x1a   :  { %s351_s8 = scalar_lea.vmem %s29_s27, 2048  ;;  %p356_p12 = scmp.lt.s32.totalorder %s29_s27, %s29_s27 }
  0x1b   :  { %p352_p11 = scmp.ne.s32.totalorder %s29_s27, %s351_s8  ;;  %p357_p13 = scmp.lt.s32.totalorder %s351_s8, %s351_s8 }
  0x1d   :  { %p358_p0 = por %p357_p13, %p356_p12 }
  0x1f   :  { %p359_p1 = pnand %p358_p0, %p352_p11 }
  0x21   :  { %362 = shalt.err (!%p359_p1)
}
  0x22   :  { %s395_s0 = smov 64   ;;  %s396_s9 = smov 4  }
  0x23   :  { %34 = dma.hbm_to_vmem [thread:$0]  %s464_s1, 2048, %s29_s27, [#allocation6], %s395_s0, %s395_s0, %s396_s9  }
  0x24   :  { %385 = dma.done.wait [#allocation3], 256  }
  0x25   :  { %386 = vsyncadd [#allocation3], 4294967040 }
  0x26   :  { %387 = dma.done.wait [#allocation6], 2048  }
  0x27   :  { %388 = vsyncadd [#allocation6], 4294965248  ;;  %v300_v0 = vld [vmem:[#allocation5 + $0x40] sm:$0xff]   ;;  %v302_v2 = vld [vmem:[#allocation5 + $0x48] sm:$0xff]   ;;  %s397_s13 = smov [#allocation7]  }
  0x28   :  { %v301_v1 = vld [vmem:[#allocation5] sm:$0xff]   ;;  %271 = vmatprep.subr.bf16.mxu0 %v300_v0  ;;  %v303_v3 = vld [vmem:[#allocation5 + $0x8] sm:$0xff]   ;;  %v304_v4 = vld [vmem:[#allocation5 + $0x50] sm:$0xff]   ;;  %s239_s14 = sshll.u32 %s397_s13, 4  ;;  %s240_s14 = int_to_ptr.vmem [resolvable:$true] %s239_s14 }
  0x29   :  { %272 = vmatpush3.bf16.msra.mxu0 %v301_v1  ;;  %v305_v5 = vld [vmem:[#allocation5 + $0x10] sm:$0xff]   ;;  %v306_v6 = vld [vmem:[#allocation5 + $0x58] sm:$0xff]   ;;  %v308_v8 = vld [vmem:[#allocation5 + $0x60] sm:$0xff]   ;;  %s363_s15 = scalar_lea.vmem %s240_s14, 256  ;;  %p368_p3 = scmp.lt.s32.totalorder %s240_s14, %s240_s14 }
  0x2a   :  { %273 = vmatprep.subr.bf16.mxu0 %v302_v2  ;;  %v307_v7 = vld [vmem:[#allocation5 + $0x18] sm:$0xff]   ;;  %v309_v9 = vld [vmem:[#allocation5 + $0x20] sm:$0xff]   ;;  %v310_v10 = vld [vmem:[#allocation5 + $0x68] sm:$0xff]   ;;  %p364_p2 = scmp.ne.s32.totalorder %s240_s14, %s363_s15  ;;  %p369_p4 = scmp.lt.s32.totalorder %s363_s15, %s363_s15 }
  0x2b   :  { %v318_v11 = vld [vmem:[#allocation2 + $0x4] ss:$8 sps:$4 sm:$0xff]   ;;  %v311_v12 = vld [vmem:[#allocation5 + $0x28] sm:$0xff]   ;;  %v316_v17 = vld [vmem:[#allocation2] ss:$8 sps:$4 sm:$0xff]  }
  0x2c   :  { %223 = vmatprep.mubr.bf16.mxu0 %v318_v11  ;;  %v312_v13 = vld [vmem:[#allocation5 + $0x70] sm:$0xff]   ;;  %v314_v15 = vld [vmem:[#allocation5 + $0x78] sm:$0xff]   ;;  %p370_p5 = por %p369_p4, %p368_p3 }
  0x2d   :  { %274 = vmatpush3.bf16.msra.mxu0 %v303_v3  ;;  %v313_v14 = vld [vmem:[#allocation5 + $0x30] sm:$0xff]   ;;  %v315_v16 = vld [vmem:[#allocation5 + $0x38] sm:$0xff]  }
  0x2e   :  { %275 = vmatprep.subr.bf16.mxu0 %v304_v4  ;;  %v252_v19 = vld [vmem:[%s465_s2] ss:$0 sm:$0xff]  ;;  %p371_p6 = pnand %p370_p5, %p364_p2 }
  0x31   :  { %276 = vmatpush3.bf16.msra.mxu0 %v305_v5 }
  0x32   :  { %277 = vmatprep.subr.bf16.mxu0 %v306_v6 }
  0x35   :  { %278 = vmatpush3.bf16.msra.mxu0 %v307_v7 }
  0x36   :  { %279 = vmatprep.subr.bf16.mxu0 %v308_v8 }
  0x39   :  { %280 = vmatpush3.bf16.msra.mxu0 %v309_v9 }
  0x3a   :  { %281 = vmatprep.subr.bf16.mxu0 %v310_v10 }
  0x3d   :  { %282 = vmatpush3.bf16.msra.mxu0 %v311_v12 }
  0x3e   :  { %283 = vmatprep.subr.bf16.mxu0 %v312_v13 }
  0x41   :  { %284 = vmatpush3.bf16.msra.mxu0 %v313_v14 }
  0x42   :  { %285 = vmatprep.subr.bf16.mxu0 %v314_v15 }
  0x45   :  { %286 = vmatpush3.bf16.msra.mxu0 %v315_v16 }
  0x48   :  { %224 = vmatmul.mubr.bf16.vlgmr.msra.gmra.mrb[0].mxu0 %v316_v17 }
 0x11b   :  { %v287_v18 = vpop.f32.mrb[0].mxu0 }
 0x11c   :  { %v288_v20 = vpop.f32.mrb[1].mxu0 }
 0x11d   :  { %v289_v21 = vadd.f32 %v288_v20, %v287_v18  ;;  %v290_v22 = vpop.f32.mrb[2].mxu0 }
 0x11e   :  { %v291_v23 = vpop.f32.mrb[3].mxu0 }
 0x11f   :  { %v226_v24 = vadd.f32 %v289_v21, %v252_v19  ;;  %v292_v25 = vadd.f32 %v291_v23, %v290_v22 }
 0x121   :  { %232 = vst [vmem:[#allocation7] sm:$0xff] %v226_v24  ;;  %v229_v26 = vadd.f32 %v292_v25, %v252_v19 }
 0x123   :  { %233 = vst [vmem:[#allocation7 + $0x8] sm:$0xff] %v229_v26 }
 0x124   :  { %374 = shalt.err (!%p371_p6)
}
 0x125   :  { %s375_s17 = scalar_lea.hbm %s466_s3, 256 }
 0x126   :  { %p376_p7 = scmp.ne.s32.totalorder %s466_s3, %s375_s17  ;;  %p379_p8 = scmp.lt.u32.totalorder %s375_s17, %s466_s3 }
 0x128   :  { %p381_p9 = pnand %p379_p8, %p376_p7 }
 0x12a   :  { %384 = shalt.err (!%p381_p9)
}
 0x12b   :  { %245 = dma.vmem_to_hbm [thread:$0]  %s240_s14, 256, %s466_s3, [#allocation4], %s392_s22, %s392_s22, %s393_s23  }
 0x12c   :  { %389 = dma.done.wait [#allocation4], 256  }
 0x12d   :  { %390 = vsyncadd [#allocation4], 4294967040 }
 0x12e   :  { %249 = vsyncpa [#allocation3], 1 }
 0x12f   :  { %250 = vsyncpa [#allocation6], 1 }
 0x130   :  { %251 = vsyncpa [#allocation4], 1 }

</bundles_post_ra>
